<compile_context>
chip_gen: v6e
topology: v6e:2x2x1
jax: 0.10.0
libtpu: 0.0.40
codegen_flags: <defaults>
</compile_context>

<pallas_src>
import jax
import jax.numpy as jnp
from jax.experimental import pallas as pl
from jax.experimental.pallas import tpu as pltpu


def _add_pos_whole_kernel(pos_ref, x_ref, o_ref):
    # pos_ref: (R, C); x_ref/o_ref: (B, R, C). Broadcast over batch.
    o_ref[...] = x_ref[...] + pos_ref[...]


def _add_pos_tile_kernel(pos_ref, x_ref, o_ref):
    # All refs are (TR, C): batch dim squeezed out -> clean 2-D elementwise add.
    o_ref[...] = x_ref[...] + pos_ref[...]


def _lane_dense_view(S, D):
    """Pick (R, C) with R*C == S*D and C a multiple of 128 lanes when possible."""
    F = S * D
    if D % 128 == 0:
        return S, D
    for cand in (1024, 512, 256, 128):
        if F % cand == 0:
            return F // cand, cand
    return S, D  # fallback: not lane-dense, still correct (masked stores)


def positional_embedding_forward(x, pos_embed, *, target_tile_bytes=2 << 20):
    """x: (B, S, D), pos_embed: (max_seq_len, D). Returns pos_embed[:S] + x."""
    B, S, D = x.shape
    max_seq_len, d_pos = pos_embed.shape
    if d_pos != D:
        raise ValueError(f"dim mismatch: x has D={D}, pos_embed has D={d_pos}")
    if S > max_seq_len:
        raise ValueError(f"seq_len {S} exceeds max_seq_len {max_seq_len}")

    out_dtype = jnp.result_type(x.dtype, pos_embed.dtype)
    itemsize = jnp.dtype(out_dtype).itemsize

    pos = pos_embed[:S, :].astype(out_dtype)  # static slice: JAX glue
    x = x.astype(out_dtype)

    # Lane-dense 2-D view of each (S, D) slab (free row-major reshape).
    R, C = _lane_dense_view(S, D)
    F = S * D
    x3 = x.reshape(B, R, C)
    pos2 = pos.reshape(R, C)

    total_bytes = (B + 1) * F * itemsize

    # ---- tiny path: whole problem as a single VMEM block, no grid --------------
    if total_bytes <= (2 << 20):
        out = pl.pallas_call(
            _add_pos_whole_kernel,
            out_shape=jax.ShapeDtypeStruct((B, R, C), out_dtype),
            in_specs=[
                pl.BlockSpec(memory_space=pltpu.MemorySpace.VMEM),
                pl.BlockSpec(memory_space=pltpu.MemorySpace.VMEM),
            ],
            out_specs=pl.BlockSpec(memory_space=pltpu.MemorySpace.VMEM),
        )(pos2, x3)
        return out.reshape(B, S, D)

    # ---- tiled streaming path --------------------------------------------------
    # Sublane packing: 8 rows (4-byte), 16 (2-byte), 32 (1-byte).
    sublane = max(8, 32 // itemsize)
    rows = max(sublane, target_tile_bytes // (C * itemsize))
    rows = (rows // sublane) * sublane
    TR = R if rows >= R else rows
    grid_r = pl.cdiv(R, TR)

    # VMEM budget: double-buffered x-in, out, pos tiles (+ slack); never lower
    # than the v6e/v7x default (32 MiB), capped well under v7x's 64 MiB physical.
    block_bytes = TR * C * itemsize
    vmem_limit = int(min(40 << 20, max(32 << 20, 6 * block_bytes + (4 << 20))))

    out = pl.pallas_call(
        _add_pos_tile_kernel,
        out_shape=jax.ShapeDtypeStruct((B, R, C), out_dtype),
        grid_spec=pltpu.PrefetchScalarGridSpec(
            num_scalar_prefetch=0,
            # Batch innermost: pos block index is constant over the inner loop,
            # so the pos tile stays resident in VMEM for all B batch rows.
            grid=(grid_r, B),
            in_specs=[
                pl.BlockSpec((TR, C), lambda r, b: (r, 0)),          # pos tile
                pl.BlockSpec((None, TR, C), lambda r, b: (b, r, 0)),  # x tile (batch squeezed)
            ],
            out_specs=pl.BlockSpec((None, TR, C), lambda r, b: (b, r, 0)),
        ),
        compiler_params=pltpu.CompilerParams(
            dimension_semantics=("parallel", "parallel"),
            vmem_limit_bytes=vmem_limit,
        ),
        cost_estimate=pl.CostEstimate(
            flops=B * F,
            transcendentals=0,
            bytes_accessed=(2 * B * F + F) * itemsize,
        ),
    )(pos2, x3)
    return out.reshape(B, S, D)


if __name__ == "__main__":
    # Small shapes consistent with the module (exercises the tiny, no-grid path):
    # batch=2, seq=8, dim=32, max_seq_len=16 (parameter longer than used seq,
    # exercising the [:x.shape[1]] slice semantics).
    B, S, D = 2, 8, 32
    MAX_SEQ_LEN = 16

    key = jax.random.PRNGKey(0)
    k_pos, k_x, k_pos2, k_x2 = jax.random.split(key, 4)

    # nn.Parameter(torch.rand(max_seq_len, dim)) -> uniform [0, 1)
    pos_embed = jax.random.uniform(k_pos, (MAX_SEQ_LEN, D), dtype=jnp.float32)
    x = jax.random.normal(k_x, (B, S, D), dtype=jnp.float32)

    out = positional_embedding_forward(x, pos_embed)
    out = jax.block_until_ready(out)
    ref = pos_embed[:S, :][None, :, :] + x
    assert out.shape == (B, S, D)
    assert jnp.allclose(out, ref, atol=1e-6, rtol=1e-6)

    # Moderate shape that exercises the tiled streaming path (grid=(2, 2),
    # 2 MiB (1024, 512) f32 tiles, pos tile resident across the batch loop).
    B2, S2, D2 = 2, 2048, 512
    pos_embed2 = jax.random.uniform(k_pos2, (S2, D2), dtype=jnp.float32)
    x2 = jax.random.normal(k_x2, (B2, S2, D2), dtype=jnp.float32)
    out2 = jax.block_until_ready(positional_embedding_forward(x2, pos_embed2))
    ref2 = pos_embed2[None, :, :] + x2
    assert out2.shape == (B2, S2, D2)
    assert jnp.allclose(out2, ref2, atol=1e-6, rtol=1e-6)

    print("KERNEL_OK")
</pallas_src>

<mosaic_0001>
module attributes {stable_mosaic.version = 11 : i64} {
  func.func @_add_pos_whole_kernel(%arg0: memref<1x256xf32, #tpu.memory_space<vmem>>, %arg1: memref<2x1x256xf32, #tpu.memory_space<vmem>>, %arg2: memref<2x1x256xf32, #tpu.memory_space<vmem>>) attributes {dimension_semantics = [], scalar_prefetch = 0 : i64, scratch_operands = 0 : i64, tpu.core_type = #tpu.core_type<tc>} {
    %c0 = arith.constant 0 : index
    %c0_0 = arith.constant 0 : index
    %c0_1 = arith.constant 0 : index
    %0 = vector.load %arg1[%c0, %c0_0, %c0_1] : memref<2x1x256xf32, #tpu.memory_space<vmem>>, vector<2x1x256xf32>
    %c0_2 = arith.constant 0 : index
    %c0_3 = arith.constant 0 : index
    %1 = vector.load %arg0[%c0_2, %c0_3] : memref<1x256xf32, #tpu.memory_space<vmem>>, vector<1x256xf32>
    %2 = vector.shape_cast %1 : vector<1x256xf32> to vector<1x1x256xf32>
    %3 = vector.broadcast %2 : vector<1x1x256xf32> to vector<2x1x256xf32>
    %4 = arith.addf %0, %3 : vector<2x1x256xf32>
    %c0_4 = arith.constant 0 : index
    %c0_5 = arith.constant 0 : index
    %c0_6 = arith.constant 0 : index
    %5 = vector.load %arg2[%c0_4, %c0_5, %c0_6] : memref<2x1x256xf32, #tpu.memory_space<vmem>>, vector<2x1x256xf32>
    tpu.vector_store %arg2[%c0_4, %c0_5, %c0_6], %4 {strides = array<i32>} : memref<2x1x256xf32, #tpu.memory_space<vmem>>, vector<2x1x256xf32>,
    return
  }
}

</mosaic_0001>

<bundles_post_ra>
// kernel: tpu_custom_call.1
= control target key start
LH: loop header
LB: loop body
LE: loop exit
PB: predicated region body
PF: predicated region fallthrough
CT: control target
= control target key end

     0   :  { %7 = vsyncpa [#allocation3], 0  ;;  %s167_s0 = inlined_call_operand.hbm [shape: f32[1,256], index: 0, kind: input, shape index: {}]   ;;  %s168_s1 = inlined_call_operand.hbm [shape: f32[2,1,256], index: 1, kind: input, shape index: {}]   ;;  %s169_s2 = inlined_call_operand.hbm [shape: f32[2,1,256], index: 2, kind: output, shape index: {}]  }
   0x1   :  { %8 = vsyncpa [#allocation6], 0 }
   0x2   :  { %9 = vsyncpa [#allocation4], 0  ;;  %s138_s9 = smov [#allocation2]   ;;  %s139_s11 = smov [#allocation5]  }
   0x3   :  { %s16_s10 = sshll.u32 %s138_s9, 4  ;;  %s25_s12 = sshll.u32 %s139_s11, 4  ;;  %s17_s10 = int_to_ptr.vmem [resolvable:$true] %s16_s10  ;;  %s26_s12 = int_to_ptr.vmem [resolvable:$true] %s25_s12 }
   0x4   :  { %s80_s13 = scalar_lea.vmem %s17_s10, 32  ;;  %p85_p1 = scmp.lt.s32.totalorder %s17_s10, %s17_s10 }
   0x5   :  { %p81_p0 = scmp.ne.s32.totalorder %s17_s10, %s80_s13  ;;  %p86_p2 = scmp.lt.s32.totalorder %s80_s13, %s80_s13 }
   0x7   :  { %p87_p3 = por %p86_p2, %p85_p1 }
   0x9   :  { %p88_p4 = pnand %p87_p3, %p81_p0 }
   0xb   :  { %91 = shalt.err (!%p88_p4)
}
   0xc   :  { %19 = dma.hbm_to_vmem [thread:$0]  %s167_s0, 32, %s17_s10, [#allocation3]  }
   0xd   :  { %s100_s16 = scalar_lea.vmem %s26_s12, 64  ;;  %p105_p6 = scmp.lt.s32.totalorder %s26_s12, %s26_s12 }
   0xe   :  { %p101_p5 = scmp.ne.s32.totalorder %s26_s12, %s100_s16  ;;  %p106_p7 = scmp.lt.s32.totalorder %s100_s16, %s100_s16 }
  0x10   :  { %p107_p8 = por %p106_p7, %p105_p6 }
  0x12   :  { %p108_p9 = pnand %p107_p8, %p101_p5 }
  0x14   :  { %111 = shalt.err (!%p108_p9)
}
  0x15   :  { %s140_s17 = smov 32   ;;  %s141_s18 = smov 2  }
  0x16   :  { %31 = dma.hbm_to_vmem [thread:$0]  %s168_s1, 64, %s26_s12, [#allocation6], %s140_s17, %s140_s17, %s141_s18  }
  0x17   :  { %132 = dma.done.wait [#allocation3], 32  }
  0x18   :  { %133 = vsyncadd [#allocation3], 4294967264 }
  0x19   :  { %134 = dma.done.wait [#allocation6], 64  }
  0x1a   :  { %135 = vsyncadd [#allocation6], 4294967232  ;;  %v43_v0 = vlaneseq  ;;  %s142_s21 = smov [#allocation7]   ;;  %v38_v1 = vld [vmem:[#allocation5] sm:$0x3] }
  0x1b   :  { %s54_s0 = sshll.u32 %s142_s21, 4  ;;  %v40_v2 = vld [vmem:[#allocation2] sm:$0x3]  ;;  %v39_v3 = vld [vmem:[#allocation5 + $0x2] sm:$0x3]  ;;  %s55_s0 = int_to_ptr.vmem [resolvable:$true] %s54_s0 }
  0x1c   :  { %vm45_vm0 = vcmp.lt.s32.totalorder %v43_v0, 256  ;;  %v41_v4 = vadd.f32 %v40_v2, %v38_v1  ;;  %v42_v5 = vadd.f32 %v40_v2, %v39_v3  ;;  %s112_s22 = scalar_lea.vmem %s55_s0, 64  ;;  %p117_p11 = scmp.lt.s32.totalorder %s55_s0, %s55_s0 }
  0x1d   :  { %p113_p10 = scmp.ne.s32.totalorder %s55_s0, %s112_s22  ;;  %p118_p12 = scmp.lt.s32.totalorder %s112_s22, %s112_s22 }
  0x1e   :  { %47 = vst.msk [vmem:[#allocation7] sm:$0x3] %vm45_vm0, %v41_v4  ;;  %48 = vst.msk [vmem:[#allocation7 + $0x2] sm:$0x3] %vm45_vm0, %v42_v5 }
  0x1f   :  { %p119_p13 = por %p118_p12, %p117_p11 }
  0x21   :  { %p120_p0 = pnand %p119_p13, %p113_p10 }
  0x23   :  { %123 = shalt.err (!%p120_p0)
}
  0x24   :  { %60 = dma.vmem_to_hbm [thread:$0]  %s55_s0, 64, %s169_s2, [#allocation4], %s140_s17, %s140_s17, %s141_s18  }
  0x25   :  { %136 = dma.done.wait [#allocation4], 64  }
  0x26   :  { %137 = vsyncadd [#allocation4], 4294967232 }
  0x27   :  { %64 = vsyncpa [#allocation3], 1 }
  0x28   :  { %65 = vsyncpa [#allocation6], 1 }
  0x29   :  { %66 = vsyncpa [#allocation4], 1 }

</bundles_post_ra>
